<compile_context>
chip_gen: v7x
topology: tpu7x:2x2x1
jax: 0.10.0
libtpu: 0.0.40
codegen_flags: <defaults>
</compile_context>

<pallas_src>
import math
import jax
import jax.numpy as jnp
from jax.experimental import pallas as pl
from jax.experimental.pallas import tpu as pltpu

# ----------------------------- model config ---------------------------------
NUM_TOKENS = 50       # vocabulary size (synthetic)
DIM_MODEL  = 32       # embedding dim
SEQ_LEN    = 46       # fixed by the module: Linear(46 * dim_model, 256)
MAX_LEN    = 46
BATCH      = 2

SCALE  = math.sqrt(DIM_MODEL)
K_IN   = SEQ_LEN * DIM_MODEL    # 1472
S_PAD  = 48                     # padded sequence length (48 * 32 = 1536)
K_PAD  = S_PAD * DIM_MODEL      # 1536 = full MXU K-passes
N_OUT  = 2
N_PAD  = 128                    # lane-dense output slab
PAD_TOKEN = NUM_TOKENS          # index of the all-zero embedding row


def _round_up(x, m):
    return ((x + m - 1) // m) * m


def _choose_tile(batch, block_b):
    """Pick a legal batch tile: >=2 grid steps for large B (v7x megacore)."""
    if batch <= 256:
        return _round_up(max(batch, 1), 16)          # single small tile
    block_b = _round_up(max(block_b, 256), 256)      # guard arbitrary block_b
    half = _round_up(pl.cdiv(batch, 2), 256)         # aim for >= 2 grid steps
    return min(block_b, half)


# ----------------------------- Pallas kernel --------------------------------
def position_nn_kernel(x_ref,
                       w1_ref, b1_ref, w2_ref, b2_ref,
                       w3_ref, b3_ref, w4_ref, b4_ref,
                       out_ref):
    # x_ref : (TB, K_PAD) bf16 — flattened scaled token embeddings (zero rows
    # for padded positions / padded batch rows).  SCALE is folded into the
    # embedding table, the positional encoding is folded into b1.
    # TODO(synk): nn.Dropout layers are identity here (eval-mode semantics).
    x = x_ref[...]                                                    # bf16

    h = jnp.dot(x, w1_ref[...], preferred_element_type=jnp.float32) + b1_ref[...]
    h = jnp.maximum(h, 0.0)                                           # f32 ReLU

    h = jnp.dot(h.astype(jnp.bfloat16), w2_ref[...],
                preferred_element_type=jnp.float32) + b2_ref[...]
    h = jnp.maximum(h, 0.0)

    h = jnp.dot(h.astype(jnp.bfloat16), w3_ref[...],
                preferred_element_type=jnp.float32) + b3_ref[...]
    h = jnp.maximum(h, 0.0)

    y = jnp.dot(h.astype(jnp.bfloat16), w4_ref[...],
                preferred_element_type=jnp.float32) + b4_ref[...]
    out_ref[...] = y.astype(out_ref.dtype)                            # (TB, 128)


# ------------------------------- wrapper -------------------------------------
def _build_x(tokens, kp, b_pad):
    """Single bf16 gather: (B,46) int32 tokens -> (b_pad, K_PAD) bf16 x."""
    B = tokens.shape[0]
    tok = jnp.pad(tokens, ((0, b_pad - B), (0, S_PAD - SEQ_LEN)),
                  constant_values=PAD_TOKEN)                  # (b_pad, 48)
    emb = jnp.take(kp["embedding"], tok, axis=0)              # (b_pad, 48, 32) bf16
    return emb.reshape(b_pad, K_PAD)                          # contiguous, free reshape


def position_nn_forward(tokens, kp, *, block_b=512):
    """tokens: (B, 46) int32, kp: packed kernel params -> logits (B, 2) f32."""
    B = tokens.shape[0]
    tb = _choose_tile(B, block_b)
    b_pad = _round_up(B, tb)
    x = _build_x(tokens, kp, b_pad)                           # (b_pad, K_PAD) bf16

    grid = (b_pad // tb,)

    def stream_map(i):                 # x / out tiles stream over the grid
        return (i, 0)

    def resident_map(i):               # weights & biases stay VMEM-resident
        return (0, 0)

    w1, b1 = kp["w1"], kp["b1"]
    w2, b2 = kp["w2"], kp["b2"]
    w3, b3 = kp["w3"], kp["b3"]
    w4, b4 = kp["w4"], kp["b4"]

    in_specs = [
        pl.BlockSpec((tb, K_PAD), stream_map),
        pl.BlockSpec(w1.shape, resident_map), pl.BlockSpec(b1.shape, resident_map),
        pl.BlockSpec(w2.shape, resident_map), pl.BlockSpec(b2.shape, resident_map),
        pl.BlockSpec(w3.shape, resident_map), pl.BlockSpec(b3.shape, resident_map),
        pl.BlockSpec(w4.shape, resident_map), pl.BlockSpec(b4.shape, resident_map),
    ]

    # Only very large tiles need the scoped-VMEM limit raised (v5e default 16 MiB).
    vmem_limit = 32 * 1024 * 1024 if tb >= 1024 else None

    out = pl.pallas_call(
        position_nn_kernel,
        out_shape=jax.ShapeDtypeStruct((b_pad, N_PAD), jnp.float32),
        grid=grid,
        in_specs=in_specs,
        out_specs=pl.BlockSpec((tb, N_PAD), stream_map),
        compiler_params=pltpu.CompilerParams(
            dimension_semantics=("parallel",),
            vmem_limit_bytes=vmem_limit),
    )(x, w1, b1, w2, b2, w3, b3, w4, b4)

    return out[:B, :N_OUT]


# --------------------------- parameter construction --------------------------
def sinusoidal_pe(max_len, dim):
    pos = jnp.arange(max_len, dtype=jnp.float32)[:, None]               # (L, 1)
    div = jnp.exp(jnp.arange(0, dim, 2, dtype=jnp.float32)
                  * (-math.log(10000.0) / dim))                         # (D/2,)
    pe = jnp.zeros((max_len, dim), dtype=jnp.float32)
    pe = pe.at[:, 0::2].set(jnp.sin(pos * div))
    pe = pe.at[:, 1::2].set(jnp.cos(pos * div))
    return pe


def init_params(key):
    """Raw parameters matching the PyTorch module (all f32)."""
    ks = jax.random.split(key, 9)

    def lin(kw, kb, fan_in, fan_out):
        bound = 1.0 / math.sqrt(fan_in)
        w = jax.random.uniform(kw, (fan_in, fan_out), jnp.float32, -bound, bound)
        b = jax.random.uniform(kb, (1, fan_out), jnp.float32, -bound, bound)
        return w, b

    emb = jax.random.normal(ks[0], (NUM_TOKENS, DIM_MODEL), jnp.float32)
    w1, b1 = lin(ks[1], ks[2], K_IN, 256)
    w2, b2 = lin(ks[3], ks[4], 256, 128)
    w3, b3 = lin(ks[5], ks[6], 128, 64)
    w4, b4 = lin(ks[7], ks[8], 64, 2)

    return {"embedding": emb, "pe": sinusoidal_pe(MAX_LEN, DIM_MODEL),
            "w1": w1, "b1": b1, "w2": w2, "b2": b2,
            "w3": w3, "b3": b3, "w4": w4, "b4": b4}


def pack_params(p):
    """Fold SCALE into the bf16 embedding table (+ zero pad row), fold PE into
    b1, pad K and output N, cast weights to bf16."""
    emb_scaled = p["embedding"] * SCALE                                  # f32
    emb_packed = jnp.concatenate(
        [emb_scaled, jnp.zeros((1, DIM_MODEL), jnp.float32)], axis=0)   # zero row
    pe_flat = p["pe"].reshape(1, K_IN)                                   # f32
    b1 = pe_flat @ p["w1"] + p["b1"]                                     # fold PE (f32)
    w1 = jnp.pad(p["w1"], ((0, K_PAD - K_IN), (0, 0)))                   # K pad (zeros)
    w4 = jnp.pad(p["w4"], ((0, 0), (0, N_PAD - N_OUT)))                  # N pad
    b4 = jnp.pad(p["b4"], ((0, 0), (0, N_PAD - N_OUT)))
    return {
        "embedding": emb_packed.astype(jnp.bfloat16),                    # (51, 32)
        "w1": w1.astype(jnp.bfloat16), "b1": b1.astype(jnp.float32),
        "w2": p["w2"].astype(jnp.bfloat16), "b2": p["b2"].astype(jnp.float32),
        "w3": p["w3"].astype(jnp.bfloat16), "b3": p["b3"].astype(jnp.float32),
        "w4": w4.astype(jnp.bfloat16), "b4": b4.astype(jnp.float32),
    }


# ------------------------------ references -----------------------------------
def reference_forward_f32(tokens, p):
    """Original module semantics, full f32 (eval mode: dropout = identity)."""
    emb = jnp.take(p["embedding"], tokens, axis=0) * SCALE
    x = emb + p["pe"][None, :, :]
    x = x.reshape(x.shape[0], -1)
    x = jnp.maximum(x @ p["w1"] + p["b1"], 0.0)
    x = jnp.maximum(x @ p["w2"] + p["b2"], 0.0)
    x = jnp.maximum(x @ p["w3"] + p["b3"], 0.0)
    return x @ p["w4"] + p["b4"]


def reference_forward_packed(tokens, kp):
    """Pure-JAX mirror of the kernel's exact bf16 casts (tight check)."""
    B = tokens.shape[0]
    x = _build_x(tokens, kp, B)                                          # bf16
    h = jnp.dot(x, kp["w1"], preferred_element_type=jnp.float32) + kp["b1"]
    h = jnp.maximum(h, 0.0)
    h = jnp.dot(h.astype(jnp.bfloat16), kp["w2"],
                preferred_element_type=jnp.float32) + kp["b2"]
    h = jnp.maximum(h, 0.0)
    h = jnp.dot(h.astype(jnp.bfloat16), kp["w3"],
                preferred_element_type=jnp.float32) + kp["b3"]
    h = jnp.maximum(h, 0.0)
    y = jnp.dot(h.astype(jnp.bfloat16), kp["w4"],
                preferred_element_type=jnp.float32) + kp["b4"]
    return y[:, :N_OUT]


# ----------------------------------- main -------------------------------------
if __name__ == "__main__":
    key = jax.random.PRNGKey(0)
    k_tok, k_par, k_big = jax.random.split(key, 3)

    tokens = jax.random.randint(k_tok, (BATCH, SEQ_LEN), 0, NUM_TOKENS, jnp.int32)
    params = init_params(k_par)
    kparams = pack_params(params)

    # --- small (serving-shape) batch -----------------------------------------
    out = position_nn_forward(tokens, kparams)
    out = jax.block_until_ready(out)
    assert out.shape == (BATCH, N_OUT)

    # Tight check vs a pure-JAX reference using the same bf16 casts.
    ref_bf16 = reference_forward_packed(tokens, kparams)
    assert jnp.allclose(out, ref_bf16, atol=5e-3, rtol=5e-3), "mismatch vs bf16 reference"

    # Loose check vs the original full-f32 module semantics (bf16 tolerance).
    ref_f32 = reference_forward_f32(tokens, params)
    max_err = float(jnp.max(jnp.abs(out - ref_f32)))
    assert max_err < 2e-2 + 5e-2 * float(jnp.max(jnp.abs(ref_f32))), \
        f"too far from f32 reference (max_err={max_err})"

    # --- larger batch: exercises the multi-step grid / megacore path ---------
    big_tokens = jax.random.randint(k_big, (600, SEQ_LEN), 0, NUM_TOKENS, jnp.int32)
    big_out = jax.block_until_ready(position_nn_forward(big_tokens, kparams))
    big_ref = reference_forward_packed(big_tokens, kparams)
    assert big_out.shape == (600, N_OUT)
    assert jnp.allclose(big_out, big_ref, atol=5e-3, rtol=5e-3), "mismatch (large batch)"

    print("KERNEL_OK")
</pallas_src>

<mosaic_0001>
module attributes {stable_mosaic.version = 11 : i64} {
  func.func @position_nn_kernel(%arg0: i32, %arg1: memref<16x1536xbf16, #tpu.memory_space<vmem>>, %arg2: memref<1536x256xbf16, #tpu.memory_space<vmem>>, %arg3: memref<1x256xf32, #tpu.memory_space<vmem>>, %arg4: memref<256x128xbf16, #tpu.memory_space<vmem>>, %arg5: memref<1x128xf32, #tpu.memory_space<vmem>>, %arg6: memref<128x64xbf16, #tpu.memory_space<vmem>>, %arg7: memref<1x64xf32, #tpu.memory_space<vmem>>, %arg8: memref<64x128xbf16, #tpu.memory_space<vmem>>, %arg9: memref<1x128xf32, #tpu.memory_space<vmem>>, %arg10: memref<16x128xf32, #tpu.memory_space<vmem>>) attributes {dimension_semantics = [#tpu.dimension_semantics<parallel>], iteration_bounds = array<i64: 1>, scalar_prefetch = 0 : i64, scratch_operands = 0 : i64, tpu.core_type = #tpu.core_type<tc>, window_params = [{transform_indices = @transform_0, window_bounds = array<i64: 16, 1536>}, {pipeline_mode = #tpu.pipeline_mode<synchronous>, transform_indices = @transform_1, window_bounds = array<i64: 1536, 256>}, {pipeline_mode = #tpu.pipeline_mode<synchronous>, transform_indices = @transform_2, window_bounds = array<i64: 1, 256>}, {pipeline_mode = #tpu.pipeline_mode<synchronous>, transform_indices = @transform_3, window_bounds = array<i64: 256, 128>}, {pipeline_mode = #tpu.pipeline_mode<synchronous>, transform_indices = @transform_4, window_bounds = array<i64: 1, 128>}, {pipeline_mode = #tpu.pipeline_mode<synchronous>, transform_indices = @transform_5, window_bounds = array<i64: 128, 64>}, {pipeline_mode = #tpu.pipeline_mode<synchronous>, transform_indices = @transform_6, window_bounds = array<i64: 1, 64>}, {pipeline_mode = #tpu.pipeline_mode<synchronous>, transform_indices = @transform_7, window_bounds = array<i64: 64, 128>}, {pipeline_mode = #tpu.pipeline_mode<synchronous>, transform_indices = @transform_8, window_bounds = array<i64: 1, 128>}, {transform_indices = @transform_9, window_bounds = array<i64: 16, 128>}]} {
    %c0 = arith.constant 0 : index
    %c0_0 = arith.constant 0 : index
    %0 = vector.load %arg1[%c0, %c0_0] : memref<16x1536xbf16, #tpu.memory_space<vmem>>, vector<16x1536xbf16>
    %c0_1 = arith.constant 0 : index
    %c0_2 = arith.constant 0 : index
    %1 = vector.load %arg2[%c0_1, %c0_2] : memref<1536x256xbf16, #tpu.memory_space<vmem>>, vector<1536x256xbf16>
    %cst = arith.constant dense<0.000000e+00> : vector<16x256xf32>
    %2 = tpu.matmul %0, %1, %cst {dimension_numbers = #tpu.dot_dimension_numbers<[1], [0], [0], [1], [0, 0, 1, 1], [], []>} : vector<16x1536xbf16>, vector<1536x256xbf16>, vector<16x256xf32> -> vector<16x256xf32>
    %c0_3 = arith.constant 0 : index
    %c0_4 = arith.constant 0 : index
    %3 = vector.load %arg3[%c0_3, %c0_4] : memref<1x256xf32, #tpu.memory_space<vmem>>, vector<1x256xf32>
    %4 = vector.broadcast %3 : vector<1x256xf32> to vector<16x256xf32>
    %5 = arith.addf %2, %4 : vector<16x256xf32>
    %cst_5 = arith.constant 0.000000e+00 : f32
    %6 = vector.broadcast %cst_5 : f32 to vector<16x256xf32>
    %7 = arith.maximumf %5, %6 : vector<16x256xf32>
    %8 = arith.truncf %7 : vector<16x256xf32> to vector<16x256xbf16>
    %c0_6 = arith.constant 0 : index
    %c0_7 = arith.constant 0 : index
    %9 = vector.load %arg4[%c0_6, %c0_7] : memref<256x128xbf16, #tpu.memory_space<vmem>>, vector<256x128xbf16>
    %cst_8 = arith.constant dense<0.000000e+00> : vector<16x128xf32>
    %10 = tpu.matmul %8, %9, %cst_8 {dimension_numbers = #tpu.dot_dimension_numbers<[1], [0], [0], [1], [0, 0, 1, 1], [], []>} : vector<16x256xbf16>, vector<256x128xbf16>, vector<16x128xf32> -> vector<16x128xf32>
    %c0_9 = arith.constant 0 : index
    %c0_10 = arith.constant 0 : index
    %11 = vector.load %arg5[%c0_9, %c0_10] : memref<1x128xf32, #tpu.memory_space<vmem>>, vector<1x128xf32>
    %12 = vector.broadcast %11 : vector<1x128xf32> to vector<16x128xf32>
    %13 = arith.addf %10, %12 : vector<16x128xf32>
    %cst_11 = arith.constant 0.000000e+00 : f32
    %14 = vector.broadcast %cst_11 : f32 to vector<16x128xf32>
    %15 = arith.maximumf %13, %14 : vector<16x128xf32>
    %16 = arith.truncf %15 : vector<16x128xf32> to vector<16x128xbf16>
    %c0_12 = arith.constant 0 : index
    %c0_13 = arith.constant 0 : index
    %17 = vector.load %arg6[%c0_12, %c0_13] : memref<128x64xbf16, #tpu.memory_space<vmem>>, vector<128x64xbf16>
    %cst_14 = arith.constant dense<0.000000e+00> : vector<16x64xf32>
    %18 = tpu.matmul %16, %17, %cst_14 {dimension_numbers = #tpu.dot_dimension_numbers<[1], [0], [0], [1], [0, 0, 1, 1], [], []>} : vector<16x128xbf16>, vector<128x64xbf16>, vector<16x64xf32> -> vector<16x64xf32>
    %c0_15 = arith.constant 0 : index
    %c0_16 = arith.constant 0 : index
    %19 = vector.load %arg7[%c0_15, %c0_16] : memref<1x64xf32, #tpu.memory_space<vmem>>, vector<1x64xf32>
    %20 = vector.broadcast %19 : vector<1x64xf32> to vector<16x64xf32>
    %21 = arith.addf %18, %20 : vector<16x64xf32>
    %cst_17 = arith.constant 0.000000e+00 : f32
    %22 = vector.broadcast %cst_17 : f32 to vector<16x64xf32>
    %23 = arith.maximumf %21, %22 : vector<16x64xf32>
    %24 = arith.truncf %23 : vector<16x64xf32> to vector<16x64xbf16>
    %c0_18 = arith.constant 0 : index
    %c0_19 = arith.constant 0 : index
    %25 = vector.load %arg8[%c0_18, %c0_19] : memref<64x128xbf16, #tpu.memory_space<vmem>>, vector<64x128xbf16>
    %cst_20 = arith.constant dense<0.000000e+00> : vector<16x128xf32>
    %26 = tpu.matmul %24, %25, %cst_20 {dimension_numbers = #tpu.dot_dimension_numbers<[1], [0], [0], [1], [0, 0, 1, 1], [], []>} : vector<16x64xbf16>, vector<64x128xbf16>, vector<16x128xf32> -> vector<16x128xf32>
    %c0_21 = arith.constant 0 : index
    %c0_22 = arith.constant 0 : index
    %27 = vector.load %arg9[%c0_21, %c0_22] : memref<1x128xf32, #tpu.memory_space<vmem>>, vector<1x128xf32>
    %28 = vector.broadcast %27 : vector<1x128xf32> to vector<16x128xf32>
    %29 = arith.addf %26, %28 : vector<16x128xf32>
    %c0_23 = arith.constant 0 : index
    %c0_24 = arith.constant 0 : index
    %30 = vector.load %arg10[%c0_23, %c0_24] : memref<16x128xf32, #tpu.memory_space<vmem>>, vector<16x128xf32>
    tpu.vector_store %arg10[%c0_23, %c0_24], %29 {strides = array<i32>} : memref<16x128xf32, #tpu.memory_space<vmem>>, vector<16x128xf32>,
    return
  }
  func.func @transform_0(%arg0: i32) -> (i32, i32) {
    %c0_i32 = arith.constant 0 : i32
    %c0_i32_0 = arith.constant 0 : i32
    return %arg0, %c0_i32 : i32, i32
  }
  func.func @transform_1(%arg0: i32) -> (i32, i32) {
    %c0_i32 = arith.constant 0 : i32
    %c0_i32_0 = arith.constant 0 : i32
    %c0_i32_1 = arith.constant 0 : i32
    return %c0_i32, %c0_i32_0 : i32, i32
  }
  func.func @transform_2(%arg0: i32) -> (i32, i32) {
    %c0_i32 = arith.constant 0 : i32
    %c0_i32_0 = arith.constant 0 : i32
    %c0_i32_1 = arith.constant 0 : i32
    return %c0_i32, %c0_i32_0 : i32, i32
  }
  func.func @transform_3(%arg0: i32) -> (i32, i32) {
    %c0_i32 = arith.constant 0 : i32
    %c0_i32_0 = arith.constant 0 : i32
    %c0_i32_1 = arith.constant 0 : i32
    return %c0_i32, %c0_i32_0 : i32, i32
  }
  func.func @transform_4(%arg0: i32) -> (i32, i32) {
    %c0_i32 = arith.constant 0 : i32
    %c0_i32_0 = arith.constant 0 : i32
    %c0_i32_1 = arith.constant 0 : i32
    return %c0_i32, %c0_i32_0 : i32, i32
  }
  func.func @transform_5(%arg0: i32) -> (i32, i32) {
    %c0_i32 = arith.constant 0 : i32
    %c0_i32_0 = arith.constant 0 : i32
    %c0_i32_1 = arith.constant 0 : i32
    return %c0_i32, %c0_i32_0 : i32, i32
  }
  func.func @transform_6(%arg0: i32) -> (i32, i32) {
    %c0_i32 = arith.constant 0 : i32
    %c0_i32_0 = arith.constant 0 : i32
    %c0_i32_1 = arith.constant 0 : i32
    return %c0_i32, %c0_i32_0 : i32, i32
  }
  func.func @transform_7(%arg0: i32) -> (i32, i32) {
    %c0_i32 = arith.constant 0 : i32
    %c0_i32_0 = arith.constant 0 : i32
    %c0_i32_1 = arith.constant 0 : i32
    return %c0_i32, %c0_i32_0 : i32, i32
  }
  func.func @transform_8(%arg0: i32) -> (i32, i32) {
    %c0_i32 = arith.constant 0 : i32
    %c0_i32_0 = arith.constant 0 : i32
    %c0_i32_1 = arith.constant 0 : i32
    return %c0_i32, %c0_i32_0 : i32, i32
  }
  func.func @transform_9(%arg0: i32) -> (i32, i32) {
    %c0_i32 = arith.constant 0 : i32
    %c0_i32_0 = arith.constant 0 : i32
    return %arg0, %c0_i32 : i32, i32
  }
}

</mosaic_0001>

<bundles_post_ra>
// kernel: tpu_custom_call.1
= control target key start
LH: loop header
LB: loop body
LE: loop exit
PB: predicated region body
PF: predicated region fallthrough
CT: control target
= control target key end

     0   :  { %14 = vsyncpa [#allocation3], 0  ;;  %s2947_s0 = inlined_call_operand.vmem [shape: bf16[16,1536], index: 0, kind: input, shape index: {}]   ;;  %s2948_s1 = inlined_call_operand.hbm [shape: bf16[1536,256], index: 1, kind: input, shape index: {}]   ;;  %s2949_s2 = inlined_call_operand.vmem [shape: f32[1,256], index: 2, kind: input, shape index: {}]   ;;  %s2950_s3 = inlined_call_operand.hbm [shape: bf16[256,128], index: 3, kind: input, shape index: {}]   ;;  %s2951_s4 = inlined_call_operand.vmem [shape: f32[1,128], index: 4, kind: input, shape index: {}]   ;;  %s2952_s5 = inlined_call_operand.vmem [shape: bf16[128,64], index: 5, kind: input, shape index: {}]   ;;  %s2953_s6 = inlined_call_operand.vmem [shape: f32[1,64], index: 6, kind: input, shape index: {}]   ;;  %s2954_s7 = inlined_call_operand.hbm [shape: bf16[64,128], index: 7, kind: input, shape index: {}]   ;;  %s2955_s8 = inlined_call_operand.vmem [shape: f32[1,128], index: 8, kind: input, shape index: {}]   ;;  %s2956_s9 = inlined_call_operand.hbm [shape: f32[16,128], index: 9, kind: output, shape index: {}]  }
   0x1   :  { %15 = vsyncpa [#allocation6], 0 }
   0x2   :  { %16 = vsyncpa [#allocation4], 0  ;;  %s2739_s30 = smov [#allocation5]   ;;  %s2645_s13 = scalar_lea.hbm %s2950_s3, 2048 }
   0x3   :  { %s38_s10 = sshll.u32 %s2739_s30, 4  ;;  %p2646_p0 = scmp.ne.s32.totalorder %s2950_s3, %s2645_s13  ;;  %s39_s10 = int_to_ptr.vmem [resolvable:$true] %s38_s10 }
   0x4   :  { %p2649_p1 = scmp.lt.u32.totalorder %s2645_s13, %s2950_s3 }
   0x6   :  { %p2651_p2 = pnand %p2649_p1, %p2646_p0 }
   0x8   :  { %2654 = shalt.err (!%p2651_p2)
}
   0x9   :  { %s2655_s18 = scalar_lea.vmem %s39_s10, 2048  ;;  %p2660_p4 = scmp.lt.s32.totalorder %s39_s10, %s39_s10 }
   0xa   :  { %p2656_p3 = scmp.ne.s32.totalorder %s39_s10, %s2655_s18  ;;  %p2661_p5 = scmp.lt.s32.totalorder %s2655_s18, %s2655_s18 }
   0xc   :  { %p2662_p6 = por %p2661_p5, %p2660_p4 }
   0xe   :  { %p2663_p7 = pnand %p2662_p6, %p2656_p3 }
  0x10   :  { %2666 = shalt.err (!%p2663_p7)
}
  0x11   :  { %s2740_s19 = smov 64   ;;  %s2741_s20 = smov 4  }
  0x12   :  { %44 = dma.hbm_to_vmem [thread:$0]  %s2950_s3, 2048, %s39_s10, [#allocation6], %s2740_s19, %s2740_s19, %s2741_s20  }
  0x13   :  { %s2742_s23 = smov [#allocation2]   ;;  %s2667_s27 = scalar_lea.hbm %s2948_s1, 24576 }
  0x14   :  { %s24_s24 = sshll.u32 %s2742_s23, 4  ;;  %p2668_p8 = scmp.ne.s32.totalorder %s2948_s1, %s2667_s27  ;;  %s25_s24 = int_to_ptr.vmem [resolvable:$true] %s24_s24 }
  0x15   :  { %p2671_p9 = scmp.lt.u32.totalorder %s2667_s27, %s2948_s1 }
  0x17   :  { %p2673_p10 = pnand %p2671_p9, %p2668_p8 }
  0x19   :  { %2676 = shalt.err (!%p2673_p10)
}
  0x1a   :  { %s2677_s12 = scalar_lea.vmem %s25_s24, 24576  ;;  %p2682_p12 = scmp.lt.s32.totalorder %s25_s24, %s25_s24 }
  0x1b   :  { %p2678_p11 = scmp.ne.s32.totalorder %s25_s24, %s2677_s12  ;;  %p2683_p13 = scmp.lt.s32.totalorder %s2677_s12, %s2677_s12 }
  0x1d   :  { %p2684_p0 = por %p2683_p13, %p2682_p12 }
  0x1f   :  { %p2685_p1 = pnand %p2684_p0, %p2678_p11 }
  0x21   :  { %2688 = shalt.err (!%p2685_p1)
}
  0x22   :  { %s2743_s3 = smov 128   ;;  %s2744_s10 = smov 8  }
  0x23   :  { %30 = dma.hbm_to_vmem [thread:$0]  %s2948_s1, 24576, %s25_s24, [#allocation3], %s2743_s3, %s2743_s3, %s2744_s10  }
  0x24   :  { %s2745_s15 = smov [#allocation7]   ;;  %s2689_s21 = scalar_lea.hbm %s2954_s7, 512 }
  0x25   :  { %s56_s16 = sshll.u32 %s2745_s15, 4  ;;  %p2690_p2 = scmp.ne.s32.totalorder %s2954_s7, %s2689_s21  ;;  %s57_s16 = int_to_ptr.vmem [resolvable:$true] %s56_s16 }
  0x26   :  { %p2693_p3 = scmp.lt.u32.totalorder %s2689_s21, %s2954_s7 }
  0x28   :  { %p2695_p4 = pnand %p2693_p3, %p2690_p2 }
  0x2a   :  { %2698 = shalt.err (!%p2695_p4)
}
  0x2b   :  { %s2699_s27 = scalar_lea.vmem %s57_s16, 512  ;;  %p2704_p6 = scmp.lt.s32.totalorder %s57_s16, %s57_s16 }
  0x2c   :  { %p2700_p5 = scmp.ne.s32.totalorder %s57_s16, %s2699_s27  ;;  %p2705_p7 = scmp.lt.s32.totalorder %s2699_s27, %s2699_s27 }
  0x2e   :  { %p2706_p8 = por %p2705_p7, %p2704_p6 }
  0x30   :  { %p2707_p9 = pnand %p2706_p8, %p2700_p5 }
  0x32   :  { %2710 = shalt.err (!%p2707_p9)
}
  0x33   :  { %62 = dma.hbm_to_vmem [thread:$0]  %s2954_s7, 512, %s57_s16, [#allocation6], %s2740_s19, %s2740_s19, %s2741_s20  }
  0x34   :  { %2733 = dma.done.wait [#allocation3], 24576  }
  0x35   :  { %2734 = vsyncadd [#allocation3], 4294942720 }
  0x36   :  { %2735 = dma.done.wait [#allocation6], 2560  }
  0x37   :  { %2736 = vsyncadd [#allocation6], 4294964736  ;;  %v2311_v0 = vld [vmem:[#allocation2 + $0x204] ss:$8 sps:$4 sm:$0xff]   ;;  %v2313_v1 = vld [vmem:[#allocation2 + $0x200] ss:$8 sps:$4 sm:$0xff]  }
  0x38   :  { %1397 = vmatprep.subr.bf16.mxu0 %v2311_v0  ;;  %v2314_v2 = vld [vmem:[#allocation2 + $0x214] ss:$8 sps:$4 sm:$0xff]   ;;  %v2316_v3 = vld [vmem:[#allocation2 + $0x210] ss:$8 sps:$4 sm:$0xff]   ;;  %v2317_v4 = vld [vmem:[#allocation2 + $0x224] ss:$8 sps:$4 sm:$0xff]  }
  0x39   :  { %1398 = vmatpush1.bf16.msra.mxu0 %v2313_v1  ;;  %v2319_v5 = vld [vmem:[#allocation2 + $0x220] ss:$8 sps:$4 sm:$0xff]   ;;  %v2320_v6 = vld [vmem:[#allocation2 + $0x234] ss:$8 sps:$4 sm:$0xff]   ;;  %v2322_v7 = vld [vmem:[#allocation2 + $0x230] ss:$8 sps:$4 sm:$0xff]  }
  0x3a   :  { %1399 = vmatprep.subr.bf16.mxu0 %v2314_v2  ;;  %v2323_v8 = vld [vmem:[#allocation2 + $0x244] ss:$8 sps:$4 sm:$0xff]   ;;  %v2325_v9 = vld [vmem:[#allocation2 + $0x240] ss:$8 sps:$4 sm:$0xff]   ;;  %v2326_v10 = vld [vmem:[#allocation2 + $0x254] ss:$8 sps:$4 sm:$0xff]  }
  0x3b   :  { %v2328_v11 = vld [vmem:[#allocation2 + $0x250] ss:$8 sps:$4 sm:$0xff]   ;;  %v2329_v12 = vld [vmem:[#allocation2 + $0x264] ss:$8 sps:$4 sm:$0xff]   ;;  %v2331_v14 = vld [vmem:[#allocation2 + $0x260] ss:$8 sps:$4 sm:$0xff]  }
  0x3c   :  { %v2356_v13 = vld [vmem:[#allocation2 + $0x4] ss:$8 sps:$4 sm:$0xff]   ;;  %v2360_v15 = vld [vmem:[#allocation2] ss:$8 sps:$4 sm:$0xff]   ;;  %v2362_v16 = vld [vmem:[#allocation2 + $0x14] ss:$8 sps:$4 sm:$0xff]  }
  0x3d   :  { %1400 = vmatpush1.bf16.msra.mxu0 %v2316_v3  ;;  %1311 = vmatprep.subr.bf16.mxu1 %v2356_v13  ;;  %v2332_v17 = vld [vmem:[#allocation2 + $0x274] ss:$8 sps:$4 sm:$0xff]   ;;  %v2334_v19 = vld [vmem:[#allocation2 + $0x270] ss:$8 sps:$4 sm:$0xff]   ;;  %v2371_v21 = vld [vmem:[#allocation2 + $0x24] ss:$8 sps:$4 sm:$0xff]  }
  0x3e   :  { %1401 = vmatprep.subr.bf16.mxu0 %v2317_v4  ;;  %1312 = vmatpush1.bf16.msra.mxu1 %v2360_v15  ;;  %v2366_v18 = vld [vmem:[%s2947_s0 + $0x14] ss:$48 sps:$4 sm:$0xff]   ;;  %v2370_v20 = vld [vmem:[#allocation2 + $0x10] ss:$8 sps:$4 sm:$0xff]   ;;  %v2376_v23 = vld [vmem:[#allocation2 + $0x20] ss:$8 sps:$4 sm:$0xff]  }
  0x3f   :  { %1313 = vmatprep.subr.bf16.mxu1 %v2362_v16  ;;  %1429 = vmatprep.mubr.bf16.mxu0 %v2366_v18  ;;  %v2335_v22 = vld [vmem:[#allocation2 + $0x284] ss:$8 sps:$4 sm:$0xff]   ;;  %v2377_v24 = vld [vmem:[#allocation2 + $0x34] ss:$8 sps:$4 sm:$0xff]   ;;  %v2337_v25 = vld [vmem:[#allocation2 + $0x280] ss:$8 sps:$4 sm:$0xff]  }
  0x40   :  { %v2338_v26 = vld [vmem:[#allocation2 + $0x294] ss:$8 sps:$4 sm:$0xff]   ;;  %v2382_v27 = vld [vmem:[#allocation2 + $0x30] ss:$8 sps:$4 sm:$0xff]   ;;  %v2383_v28 = vld [vmem:[#allocation2 + $0x44] ss:$8 sps:$4 sm:$0xff]  }
  0x41   :  { %1402 = vmatpush1.bf16.msra.mxu0 %v2319_v5  ;;  %v2340_v29 = vld [vmem:[#allocation2 + $0x290] ss:$8 sps:$4 sm:$0xff]   ;;  %v2341_v30 = vld [vmem:[#allocation2 + $0x2a4] ss:$8 sps:$4 sm:$0xff]   ;;  %v2388_v31 = vld [vmem:[#allocation2 + $0x40] ss:$8 sps:$4 sm:$0xff]  }
  0x42   :  { %1403 = vmatprep.subr.bf16.mxu0 %v2320_v6  ;;  %1314 = vmatpush1.bf16.msra.mxu1 %v2370_v20  ;;  %v2389_v32 = vld [vmem:[#allocation2 + $0x54] ss:$8 sps:$4 sm:$0xff]   ;;  %v2343_v33 = vld [vmem:[#allocation2 + $0x2a0] ss:$8 sps:$4 sm:$0xff]   ;;  %v2394_v35 = vld [vmem:[#allocation2 + $0x50] ss:$8 sps:$4 sm:$0xff]  }
  0x43   :  { %1315 = vmatprep.subr.bf16.mxu1 %v2371_v21  ;;  %v2344_v34 = vld [vmem:[#allocation2 + $0x2b4] ss:$8 sps:$4 sm:$0xff]   ;;  %v2395_v36 = vld [vmem:[#allocation2 + $0x64] ss:$8 sps:$4 sm:$0xff]   ;;  %v2346_v37 = vld [vmem:[#allocation2 + $0x2b0] ss:$8 sps:$4 sm:$0xff]  }
  0x44   :  { %v2347_v38 = vld [vmem:[#allocation2 + $0x2c4] ss:$8 sps:$4 sm:$0xff]   ;;  %v2400_v39 = vld [vmem:[#allocation2 + $0x60] ss:$8 sps:$4 sm:$0xff]   ;;  %v2401_v40 = vld [vmem:[#allocation2 + $0x74] ss:$8 sps:$4 sm:$0xff]  }
  0x45   :  { %1404 = vmatpush1.bf16.msra.mxu0 %v2322_v7  ;;  %v2349_v41 = vld [vmem:[#allocation2 + $0x2c0] ss:$8 sps:$4 sm:$0xff]   ;;  %v2350_v42 = vld [vmem:[#allocation2 + $0x2d4] ss:$8 sps:$4 sm:$0xff]   ;;  %v2406_v43 = vld [vmem:[#allocation2 + $0x70] ss:$8 sps:$4 sm:$0xff]  }
  0x46   :  { %1405 = vmatprep.subr.bf16.mxu0 %v2323_v8  ;;  %1316 = vmatpush1.bf16.msra.mxu1 %v2376_v23  ;;  %v2407_v44 = vld [vmem:[#allocation2 + $0x84] ss:$8 sps:$4 sm:$0xff]   ;;  %v2352_v45 = vld [vmem:[#allocation2 + $0x2d0] ss:$8 sps:$4 sm:$0xff]   ;;  %v2412_v47 = vld [vmem:[#allocation2 + $0x80] ss:$8 sps:$4 sm:$0xff]  }
  0x47   :  { %1317 = vmatprep.subr.bf16.mxu1 %v2377_v24  ;;  %v2353_v46 = vld [vmem:[#allocation2 + $0x2e4] ss:$8 sps:$4 sm:$0xff]   ;;  %v2413_v48 = vld [vmem:[#allocation2 + $0x94] ss:$8 sps:$4 sm:$0xff]   ;;  %v2355_v49 = vld [vmem:[#allocation2 + $0x2e0] ss:$8 sps:$4 sm:$0xff]  }
  0x48   :  { %v2358_v50 = vld [vmem:[#allocation2 + $0x2f4] ss:$8 sps:$4 sm:$0xff]   ;;  %v2418_v51 = vld [vmem:[#allocation2 + $0x90] ss:$8 sps:$4 sm:$0xff]   ;;  %v2419_v52 = vld [vmem:[#allocation2 + $0xa4] ss:$8 sps:$4 sm:$0xff]  }
  0x49   :  { %1406 = vmatpush1.bf16.msra.mxu0 %v2325_v9  ;;  %v2361_v53 = vld [vmem:[#allocation2 + $0x2f0] ss:$8 sps:$4 sm:$0xff]   ;;  %v2369_v54 = vld [vmem:[#allocation2 + $0x304] ss:$8 sps:$4 sm:$0xff]   ;;  %v2424_v55 = vld [vmem:[#allocation2 + $0xa0] ss:$8 sps:$4 sm:$0xff]  }
  0x4a   :  { %1407 = vmatprep.subr.bf16.mxu0 %v2326_v10  ;;  %1318 = vmatpush1.bf16.msra.mxu1 %v2382_v27  ;;  %v2425_v56 = vld [vmem:[#allocation2 + $0xb4] ss:$8 sps:$4 sm:$0xff]   ;;  %v2364_v57 = vld [vmem:[%s2947_s0 + $0x10] ss:$48 sps:$4 sm:$0xff]   ;;  %v2431_v61 = vld [vmem:[#allocation2 + $0xc4] ss:$8 sps:$4 sm:$0xff]  }
  0x4b   :  { %1319 = vmatprep.subr.bf16.mxu1 %v2383_v28  ;;  %v2367_v58 = vld [vmem:[#allocation2 + $0x300] ss:$8 sps:$4 sm:$0xff]   ;;  %v2375_v59 = vld [vmem:[#allocation2 + $0x314] ss:$8 sps:$4 sm:$0xff]   ;;  %v2430_v60 = vld [vmem:[#allocation2 + $0xb0] ss:$8 sps:$4 sm:$0xff]  }
  0x4c   :  { %v2457_v62 = vld [vmem:[%s2947_s0 + $0x4] ss:$48 sps:$4 sm:$0xff]   ;;  %v2373_v63 = vld [vmem:[#allocation2 + $0x310] ss:$8 sps:$4 sm:$0xff]   ;;  %v2436_v1 = vld [vmem:[#allocation2 + $0xc0] ss:$8 sps:$4 sm:$0xff]  }
  0x4d   :  { %1408 = vmatpush1.bf16.msra.mxu0 %v2328_v11  ;;  %v2381_v0 = vld [vmem:[#allocation2 + $0x324] ss:$8 sps:$4 sm:$0xff]   ;;  %1343 = vmatprep.mubr.bf16.mxu1 %v2457_v62  ;;  %v2437_v2 = vld [vmem:[#allocation2 + $0xd4] ss:$8 sps:$4 sm:$0xff]   ;;  %v2379_v4 = vld [vmem:[#allocation2 + $0x320] ss:$8 sps:$4 sm:$0xff]  }
  0x4e   :  { %1409 = vmatprep.subr.bf16.mxu0 %v2329_v12  ;;  %1320 = vmatpush1.bf16.msra.mxu1 %v2388_v31  ;;  %v2469_v3 = vld [vmem:[%s2947_s0 + $0x1c] ss:$48 sps:$4 sm:$0xff]   ;;  %v2442_v6 = vld [vmem:[#allocation2 + $0xd0] ss:$8 sps:$4 sm:$0xff]   ;;  %v2448_v10 = vld [vmem:[#allocation2 + $0xe0] ss:$8 sps:$4 sm:$0xff]  }
  0x4f   :  { %1321 = vmatprep.subr.bf16.mxu1 %v2389_v32  ;;  %v2387_v5 = vld [vmem:[#allocation2 + $0x334] ss:$8 sps:$4 sm:$0xff]   ;;  %v2443_v7 = vld [vmem:[#allocation2 + $0xe4] ss:$8 sps:$4 sm:$0xff]   ;;  %v2385_v8 = vld [vmem:[#allocation2 + $0x330] ss:$8 sps:$4 sm:$0xff]  }
  0x50   :  { %v2393_v9 = vld [vmem:[#allocation2 + $0x344] ss:$8 sps:$4 sm:$0xff]   ;;  %v2449_v11 = vld [vmem:[#allocation2 + $0xf4] ss:$8 sps:$4 sm:$0xff]   ;;  %v2391_v12 = vld [vmem:[#allocation2 + $0x340] ss:$8 sps:$4 sm:$0xff]  }
  0x51   :  { %1410 = vmatpush1.bf16.msra.mxu0 %v2331_v14  ;;  %v2399_v13 = vld [vmem:[#allocation2 + $0x354] ss:$8 sps:$4 sm:$0xff]   ;;  %v2454_v14 = vld [vmem:[#allocation2 + $0xf0] ss:$8 sps:$4 sm:$0xff]   ;;  %v2460_v15 = vld [vmem:[#allocation2 + $0x104] ss:$8 sps:$4 sm:$0xff]  }
  0x52   :  { %1411 = vmatprep.subr.bf16.mxu0 %v2332_v17  ;;  %1322 = vmatpush1.bf16.msra.mxu1 %v2394_v35  ;;  %v2397_v16 = vld [vmem:[#allocation2 + $0x350] ss:$8 sps:$4 sm:$0xff]   ;;  %v2405_v17 = vld [vmem:[#allocation2 + $0x364] ss:$8 sps:$4 sm:$0xff]   ;;  %v2466_v20 = vld [vmem:[#allocation2 + $0x114] ss:$8 sps:$4 sm:$0xff]  }
  0x53   :  { %1323 = vmatprep.subr.bf16.mxu1 %v2395_v36  ;;  %v2455_v18 = vld [vmem:[%s2947_s0] ss:$48 sps:$4 sm:$0xff]   ;;  %v2475_v24 = vld [vmem:[#allocation2 + $0x124] ss:$8 sps:$4 sm:$0xff]   ;;  %v2481_v28 = vld [vmem:[#allocation2 + $0x134] ss:$8 sps:$4 sm:$0xff]  }
  0x54   :  { %v2403_v21 = vld [vmem:[#allocation2 + $0x360] ss:$8 sps:$4 sm:$0xff]   ;;  %v2464_v23 = vld [vmem:[#allocation2 + $0x110] ss:$8 sps:$4 sm:$0xff]   ;;  %v2487_v32 = vld [vmem:[#allocation2 + $0x144] ss:$8 sps:$4 sm:$0xff]  }
  0x55   :  { %1412 = vmatpush1.bf16.msra.mxu0 %v2334_v19  ;;  %v2458_v19 = vld [vmem:[#allocation2 + $0x100] ss:$8 sps:$4 sm:$0xff]   ;;  %v2479_v31 = vld [vmem:[#allocation2 + $0x130] ss:$8 sps:$4 sm:$0xff]   ;;  %v2493_v36 = vld [vmem:[#allocation2 + $0x154] ss:$8 sps:$4 sm:$0xff]  }
  0x56   :  { %1413 = vmatprep.subr.bf16.mxu0 %v2335_v22  ;;  %1324 = vmatpush1.bf16.msra.mxu1 %v2400_v39  ;;  %v2411_v22 = vld [vmem:[#allocation2 + $0x374] ss:$8 sps:$4 sm:$0xff]   ;;  %v2473_v27 = vld [vmem:[#allocation2 + $0x120] ss:$8 sps:$4 sm:$0xff]   ;;  %v2491_v39 = vld [vmem:[#allocation2 + $0x150] ss:$8 sps:$4 sm:$0xff]  }
  0x57   :  { %1325 = vmatprep.subr.bf16.mxu1 %v2401_v40  ;;  %v2485_v35 = vld [vmem:[#allocation2 + $0x140] ss:$8 sps:$4 sm:$0xff]   ;;  %v2499_v40 = vld [vmem:[#allocation2 + $0x164] ss:$8 sps:$4 sm:$0xff]   ;;  %vm2747_vm0 = vmmov 0   ;;  %vm1908_vm1 = vcmask 523264  }
  0x58   :  { %v2467_v62 = vld [vmem:[%s2947_s0 + $0x18] ss:$48 sps:$4 sm:$0xff]   ;;  %s2748_s7 = smov [#allocation8]  }
  0x59   :  { %1414 = vmatpush1.bf16.msra.mxu0 %v2337_v25  ;;  %v2409_v25 = vld [vmem:[#allocation2 + $0x370] ss:$8 sps:$4 sm:$0xff]   ;;  %s1960_s19 = sshll.u32 %s2748_s7, 4  ;;  %s1961_s19 = int_to_ptr.vmem [resolvable:$true] %s1960_s19 }
  0x5a   :  { %1415 = vmatprep.subr.bf16.mxu0 %v2338_v26  ;;  %1326 = vmatpush1.bf16.msra.mxu1 %v2406_v43  ;;  %v2417_v26 = vld [vmem:[#allocation2 + $0x384] ss:$8 sps:$4 sm:$0xff]   ;;  %v2497_v43 = vld [vmem:[#allocation2 + $0x160] ss:$8 sps:$4 sm:$0xff]   ;;  %p2716_p11 = scmp.lt.s32.totalorder %s1961_s19, %s1961_s19 }
  0x5b   :  { %1327 = vmatprep.subr.bf16.mxu1 %v2407_v44  ;;  %v2505_v44 = vld [vmem:[#allocation2 + $0x174] ss:$8 sps:$4 sm:$0xff]  }
  0x5d   :  { %1416 = vmatpush1.bf16.msra.mxu0 %v2340_v29  ;;  %v2415_v29 = vld [vmem:[#allocation2 + $0x380] ss:$8 sps:$4 sm:$0xff]  }
  0x5e   :  { %1417 = vmatprep.subr.bf16.mxu0 %v2341_v30  ;;  %1328 = vmatpush1.bf16.msra.mxu1 %v2412_v47  ;;  %v2423_v30 = vld [vmem:[#allocation2 + $0x394] ss:$8 sps:$4 sm:$0xff]  }
  0x5f   :  { %1329 = vmatprep.subr.bf16.mxu1 %v2413_v48  ;;  %v2447_v47 = vld [vmem:[#allocation2 + $0x3d4] ss:$8 sps:$4 sm:$0xff]   ;;  %v2503_v48 = vld [vmem:[#allocation2 + $0x170] ss:$8 sps:$4 sm:$0xff]  }
  0x61   :  { %1418 = vmatpush1.bf16.msra.mxu0 %v2343_v33  ;;  %v2421_v33 = vld [vmem:[#allocation2 + $0x390] ss:$8 sps:$4 sm:$0xff]  }
  0x62   :  { %1419 = vmatprep.subr.bf16.mxu0 %v2344_v34  ;;  %1330 = vmatpush1.bf16.msra.mxu1 %v2418_v51  ;;  %v2429_v34 = vld [vmem:[#allocation2 + $0x3a4] ss:$8 sps:$4 sm:$0xff]  }
  0x63   :  { %1331 = vmatprep.subr.bf16.mxu1 %v2419_v52  ;;  %v2453_v51 = vld [vmem:[#allocation2 + $0x3e4] ss:$8 sps:$4 sm:$0xff]   ;;  %v2509_v52 = vld [vmem:[#allocation2 + $0x180] ss:$8 sps:$4 sm:$0xff]  }
  0x65   :  { %1420 = vmatpush1.bf16.msra.mxu0 %v2346_v37  ;;  %v2427_v37 = vld [vmem:[#allocation2 + $0x3a0] ss:$8 sps:$4 sm:$0xff]  }
  0x66   :  { %1421 = vmatprep.subr.bf16.mxu0 %v2347_v38  ;;  %1332 = vmatpush1.bf16.msra.mxu1 %v2424_v55  ;;  %v2435_v38 = vld [vmem:[#allocation2 + $0x3b4] ss:$8 sps:$4 sm:$0xff]  }
  0x67   :  { %1333 = vmatprep.subr.bf16.mxu1 %v2425_v56  ;;  %v2463_v55 = vld [vmem:[#allocation2 + $0x3f4] ss:$8 sps:$4 sm:$0xff]   ;;  %v2515_v56 = vld [vmem:[#allocation2 + $0x190] ss:$8 sps:$4 sm:$0xff]  }
  0x69   :  { %1422 = vmatpush1.bf16.msra.mxu0 %v2349_v41  ;;  %v2433_v41 = vld [vmem:[#allocation2 + $0x3b0] ss:$8 sps:$4 sm:$0xff]  }
  0x6a   :  { %1423 = vmatprep.subr.bf16.mxu0 %v2350_v42  ;;  %1334 = vmatpush1.bf16.msra.mxu1 %v2430_v60  ;;  %v2441_v42 = vld [vmem:[#allocation2 + $0x3c4] ss:$8 sps:$4 sm:$0xff]   ;;  %v2521_v60 = vld [vmem:[#allocation2 + $0x1a0] ss:$8 sps:$4 sm:$0xff]  }
  0x6b   :  { %1335 = vmatprep.subr.bf16.mxu1 %v2431_v61  ;;  %v2529_v61 = vld [vmem:[#allocation2 + $0x1b4] ss:$8 sps:$4 sm:$0xff]  }
  0x6d   :  { %1424 = vmatpush1.bf16.msra.mxu0 %v2352_v45  ;;  %v2559_v45 = vld [vmem:[%s2947_s0 + $0xc] ss:$48 sps:$4 sm:$0xff]  }
  0x6e   :  { %1425 = vmatprep.subr.bf16.mxu0 %v2353_v46  ;;  %1336 = vmatpush1.bf16.msra.mxu1 %v2436_v1  ;;  %v2439_v46 = vld [vmem:[#allocation2 + $0x3c0] ss:$8 sps:$4 sm:$0xff]   ;;  %v2565_v1 = vld [vmem:[%s2947_s0 + $0x24] ss:$48 sps:$4 sm:$0xff]  }
  0x6f   :  { %1337 = vmatprep.subr.bf16.mxu1 %v2437_v2  ;;  %v2527_v2 = vld [vmem:[#allocation2 + $0x1b0] ss:$8 sps:$4 sm:$0xff]  }
  0x71   :  { %1426 = vmatpush1.bf16.msra.mxu0 %v2355_v49  ;;  %v2511_v49 = vld [vmem:[#allocation2 + $0x184] ss:$8 sps:$4 sm:$0xff]  }
  0x72   :  { %1427 = vmatprep.subr.bf16.mxu0 %v2358_v50  ;;  %1338 = vmatpush1.bf16.msra.mxu1 %v2442_v6  ;;  %v2445_v50 = vld [vmem:[#allocation2 + $0x3d0] ss:$8 sps:$4 sm:$0xff]   ;;  %v2533_v6 = vld [vmem:[#allocation2 + $0x1c0] ss:$8 sps:$4 sm:$0xff]  }
  0x73   :  { %1339 = vmatprep.subr.bf16.mxu1 %v2443_v7  ;;  %v2541_v7 = vld [vmem:[#allocation2 + $0x1d4] ss:$8 sps:$4 sm:$0xff]  }
  0x75   :  { %1428 = vmatpush1.bf16.msra.mxu0 %v2361_v53  ;;  %v2517_v53 = vld [vmem:[#allocation2 + $0x194] ss:$8 sps:$4 sm:$0xff]  }
  0x76   :  { %1440 = vmatprep.subr.bf16.mxu0 %v2369_v54  ;;  %1340 = vmatpush1.bf16.msra.mxu1 %v2448_v10  ;;  %v2451_v54 = vld [vmem:[#allocation2 + $0x3e0] ss:$8 sps:$4 sm:$0xff]   ;;  %v2539_v10 = vld [vmem:[#allocation2 + $0x1d0] ss:$8 sps:$4 sm:$0xff]  }
  0x77   :  { %1341 = vmatprep.subr.bf16.mxu1 %v2449_v11  ;;  %v2547_v11 = vld [vmem:[#allocation2 + $0x1e4] ss:$8 sps:$4 sm:$0xff]  }
  0x78   :  { %1430 = vmatmul.mubr.bf16.vlgmr.msra.gmra.mrb[0].mxu0 %v2364_v57  ;;  %v2523_v57 = vld [vmem:[#allocation2 + $0x1a4] ss:$8 sps:$4 sm:$0xff]  }
  0x79   :  { %1441 = vmatpush1.bf16.msra.mxu0 %v2367_v58  ;;  %1472 = vmatprep.mubr.bf16.mxu0 %v2469_v3  ;;  %v2461_v58 = vld [vmem:[#allocation2 + $0x3f0] ss:$8 sps:$4 sm:$0xff]   ;;  %v2535_v3 = vld [vmem:[#allocation2 + $0x1c4] ss:$8 sps:$4 sm:$0xff]  }
  0x7a   :  { %1442 = vmatprep.subr.bf16.mxu0 %v2375_v59  ;;  %1342 = vmatpush1.bf16.msra.mxu1 %v2454_v14  ;;  %v2472_v59 = vld [vmem:[#allocation2 + $0x404] ss:$8 sps:$4 sm:$0xff]   ;;  %v2545_v14 = vld [vmem:[#allocation2 + $0x1e0] ss:$8 sps:$4 sm:$0xff]  }
  0x7b   :  { %1354 = vmatprep.subr.bf16.mxu1 %v2460_v15  ;;  %v2553_v15 = vld [vmem:[#allocation2 + $0x1f4] ss:$8 sps:$4 sm:$0xff]  }
  0x7d   :  { %1443 = vmatpush1.bf16.msra.mxu0 %v2373_v63  ;;  %1344 = vmatmul.mubr.bf16.vlgmr.msra.gmra.mrb[0].mxu1 %v2455_v18  ;;  %v2470_v63 = vld [vmem:[#allocation2 + $0x400] ss:$8 sps:$4 sm:$0xff]   ;;  %v2551_v18 = vld [vmem:[#allocation2 + $0x1f0] ss:$8 sps:$4 sm:$0xff]  }
  0x7e   :  { %1444 = vmatprep.subr.bf16.mxu0 %v2381_v0  ;;  %1355 = vmatpush1.bf16.msra.mxu1 %v2458_v19  ;;  %v2478_v0 = vld [vmem:[#allocation2 + $0x414] ss:$8 sps:$4 sm:$0xff]   ;;  %v2500_v19 = vld [vmem:[#allocation2 + $0x450] ss:$8 sps:$4 sm:$0xff]  }
  0x7f   :  { %1356 = vmatprep.subr.bf16.mxu1 %v2466_v20  ;;  %1386 = vmatprep.mubr.bf16.mxu1 %v2559_v45  ;;  %v2557_v20 = vld [vmem:[%s2947_s0 + $0x8] ss:$48 sps:$4 sm:$0xff]   ;;  %v2571_v45 = vld [vmem:[#allocation2 + $0x514] ss:$8 sps:$4 sm:$0xff]  }
  0x81   :  { %1445 = vmatpush1.bf16.msra.mxu0 %v2379_v4  ;;  %v2476_v4 = vld [vmem:[#allocation2 + $0x410] ss:$8 sps:$4 sm:$0xff]  }
  0x82   :  { %1446 = vmatprep.subr.bf16.mxu0 %v2387_v5  ;;  %1357 = vmatpush1.bf16.msra.mxu1 %v2464_v23  ;;  %v2484_v5 = vld [vmem:[#allocation2 + $0x424] ss:$8 sps:$4 sm:$0xff]   ;;  %v2514_v23 = vld [vmem:[#allocation2 + $0x474] ss:$8 sps:$4 sm:$0xff]  }
  0x83   :  { %1358 = vmatprep.subr.bf16.mxu1 %v2475_v24  ;;  %v2512_v24 = vld [vmem:[#allocation2 + $0x470] ss:$8 sps:$4 sm:$0xff]  }
  0x85   :  { %1447 = vmatpush1.bf16.msra.mxu0 %v2385_v8  ;;  %v2482_v8 = vld [vmem:[#allocation2 + $0x420] ss:$8 sps:$4 sm:$0xff]  }
  0x86   :  { %1448 = vmatprep.subr.bf16.mxu0 %v2393_v9  ;;  %1359 = vmatpush1.bf16.msra.mxu1 %v2473_v27  ;;  %v2490_v9 = vld [vmem:[#allocation2 + $0x434] ss:$8 sps:$4 sm:$0xff]  }
  0x87   :  { %1360 = vmatprep.subr.bf16.mxu1 %v2481_v28  ;;  %v2526_v27 = vld [vmem:[#allocation2 + $0x494] ss:$8 sps:$4 sm:$0xff]   ;;  %v2524_v28 = vld [vmem:[#allocation2 + $0x490] ss:$8 sps:$4 sm:$0xff]  }
  0x89   :  { %1449 = vmatpush1.bf16.msra.mxu0 %v2391_v12  ;;  %v2488_v12 = vld [vmem:[#allocation2 + $0x430] ss:$8 sps:$4 sm:$0xff]  }
  0x8a   :  { %1450 = vmatprep.subr.bf16.mxu0 %v2399_v13  ;;  %1361 = vmatpush1.bf16.msra.mxu1 %v2479_v31  ;;  %v2496_v13 = vld [vmem:[#allocation2 + $0x444] ss:$8 sps:$4 sm:$0xff]   ;;  %v2538_v31 = vld [vmem:[#allocation2 + $0x4b4] ss:$8 sps:$4 sm:$0xff]  }
  0x8b   :  { %1362 = vmatprep.subr.bf16.mxu1 %v2487_v32  ;;  %v2536_v32 = vld [vmem:[#allocation2 + $0x4b0] ss:$8 sps:$4 sm:$0xff]  }
  0x8d   :  { %1451 = vmatpush1.bf16.msra.mxu0 %v2397_v16  ;;  %v2494_v16 = vld [vmem:[#allocation2 + $0x440] ss:$8 sps:$4 sm:$0xff]  }
  0x8e   :  { %1452 = vmatprep.subr.bf16.mxu0 %v2405_v17  ;;  %1363 = vmatpush1.bf16.msra.mxu1 %v2485_v35  ;;  %v2502_v17 = vld [vmem:[#allocation2 + $0x454] ss:$8 sps:$4 sm:$0xff]  }
  0x8f   :  { %1364 = vmatprep.subr.bf16.mxu1 %v2493_v36  ;;  %v2550_v35 = vld [vmem:[#allocation2 + $0x4d4] ss:$8 sps:$4 sm:$0xff]   ;;  %v2548_v36 = vld [vmem:[#allocation2 + $0x4d0] ss:$8 sps:$4 sm:$0xff]  }
  0x91   :  { %1453 = vmatpush1.bf16.msra.mxu0 %v2403_v21  ;;  %v2508_v21 = vld [vmem:[#allocation2 + $0x464] ss:$8 sps:$4 sm:$0xff]  }
  0x92   :  { %1454 = vmatprep.subr.bf16.mxu0 %v2411_v22  ;;  %1365 = vmatpush1.bf16.msra.mxu1 %v2491_v39  ;;  %v2506_v22 = vld [vmem:[#allocation2 + $0x460] ss:$8 sps:$4 sm:$0xff]   ;;  %v2562_v39 = vld [vmem:[#allocation2 + $0x4f4] ss:$8 sps:$4 sm:$0xff]  }
  0x93   :  { %1366 = vmatprep.subr.bf16.mxu1 %v2499_v40  ;;  %v2560_v40 = vld [vmem:[#allocation2 + $0x4f0] ss:$8 sps:$4 sm:$0xff]  }
  0x95   :  { %1455 = vmatpush1.bf16.msra.mxu0 %v2409_v25  ;;  %v2520_v25 = vld [vmem:[#allocation2 + $0x484] ss:$8 sps:$4 sm:$0xff]  }
  0x96   :  { %1456 = vmatprep.subr.bf16.mxu0 %v2417_v26  ;;  %1367 = vmatpush1.bf16.msra.mxu1 %v2497_v43  ;;  %v2518_v26 = vld [vmem:[#allocation2 + $0x480] ss:$8 sps:$4 sm:$0xff]  }
  0x97   :  { %1368 = vmatprep.subr.bf16.mxu1 %v2505_v44  ;;  %v2566_v43 = vld [vmem:[#allocation2 + $0x500] ss:$8 sps:$4 sm:$0xff]   ;;  %v2616_v44 = vld [vmem:[%s2947_s0 + $0x2c] ss:$48 sps:$4 sm:$0xff]  }
  0x99   :  { %1457 = vmatpush1.bf16.msra.mxu0 %v2415_v29  ;;  %v2532_v29 = vld [vmem:[#allocation2 + $0x4a4] ss:$8 sps:$4 sm:$0xff]  }
  0x9a   :  { %1458 = vmatprep.subr.bf16.mxu0 %v2423_v30  ;;  %1369 = vmatpush1.bf16.msra.mxu1 %v2503_v48  ;;  %v2530_v30 = vld [vmem:[#allocation2 + $0x4a0] ss:$8 sps:$4 sm:$0xff]  }
  0x9b   :  { %1370 = vmatprep.subr.bf16.mxu1 %v2511_v49  ;;  %v2572_v48 = vld [vmem:[#allocation2 + $0x520] ss:$8 sps:$4 sm:$0xff]   ;;  %v2577_v49 = vld [vmem:[#allocation2 + $0x534] ss:$8 sps:$4 sm:$0xff]  }
  0x9d   :  { %1459 = vmatpush1.bf16.msra.mxu0 %v2421_v33  ;;  %v2544_v33 = vld [vmem:[#allocation2 + $0x4c4] ss:$8 sps:$4 sm:$0xff]  }
  0x9e   :  { %1460 = vmatprep.subr.bf16.mxu0 %v2429_v34  ;;  %1371 = vmatpush1.bf16.msra.mxu1 %v2509_v52  ;;  %v2542_v34 = vld [vmem:[#allocation2 + $0x4c0] ss:$8 sps:$4 sm:$0xff]  }
  0x9f   :  { %1372 = vmatprep.subr.bf16.mxu1 %v2517_v53  ;;  %v2578_v52 = vld [vmem:[#allocation2 + $0x540] ss:$8 sps:$4 sm:$0xff]   ;;  %v2583_v53 = vld [vmem:[#allocation2 + $0x554] ss:$8 sps:$4 sm:$0xff]  }
  0xa1   :  { %1461 = vmatpush1.bf16.msra.mxu0 %v2427_v37  ;;  %v2556_v37 = vld [vmem:[#allocation2 + $0x4e4] ss:$8 sps:$4 sm:$0xff]  }
  0xa2   :  { %1462 = vmatprep.subr.bf16.mxu0 %v2435_v38  ;;  %1373 = vmatpush1.bf16.msra.mxu1 %v2515_v56  ;;  %v2554_v38 = vld [vmem:[#allocation2 + $0x4e0] ss:$8 sps:$4 sm:$0xff]  }
  0xa3   :  { %1374 = vmatprep.subr.bf16.mxu1 %v2523_v57  ;;  %v2584_v56 = vld [vmem:[#allocation2 + $0x560] ss:$8 sps:$4 sm:$0xff]   ;;  %v2589_v57 = vld [vmem:[#allocation2 + $0x574] ss:$8 sps:$4 sm:$0xff]  }
  0xa5   :  { %1463 = vmatpush1.bf16.msra.mxu0 %v2433_v41  ;;  %v2568_v41 = vld [vmem:[#allocation2 + $0x504] ss:$8 sps:$4 sm:$0xff]  }
  0xa6   :  { %1464 = vmatprep.subr.bf16.mxu0 %v2441_v42  ;;  %1375 = vmatpush1.bf16.msra.mxu1 %v2521_v60  ;;  %v2563_v42 = vld [vmem:[%s2947_s0 + $0x20] ss:$48 sps:$4 sm:$0xff]  }
  0xa7   :  { %1376 = vmatprep.subr.bf16.mxu1 %v2529_v61  ;;  %v2590_v60 = vld [vmem:[#allocation2 + $0x580] ss:$8 sps:$4 sm:$0xff]   ;;  %v2595_v61 = vld [vmem:[#allocation2 + $0x594] ss:$8 sps:$4 sm:$0xff]  }
  0xa9   :  { %1465 = vmatpush1.bf16.msra.mxu0 %v2439_v46  ;;  %v2569_v46 = vld [vmem:[#allocation2 + $0x510] ss:$8 sps:$4 sm:$0xff]  }
  0xaa   :  { %1466 = vmatprep.subr.bf16.mxu0 %v2447_v47  ;;  %1377 = vmatpush1.bf16.msra.mxu1 %v2527_v2  ;;  %v2574_v47 = vld [vmem:[#allocation2 + $0x524] ss:$8 sps:$4 sm:$0xff]   ;;  %v2599_v2 = vld [vmem:[#allocation2 + $0x5b0] ss:$8 sps:$4 sm:$0xff]  }
  0xab   :  { %1378 = vmatprep.subr.bf16.mxu1 %v2535_v3  ;;  %v2604_v3 = vld [vmem:[#allocation2 + $0x5c4] ss:$8 sps:$4 sm:$0xff]  }
  0xad   :  { %1467 = vmatpush1.bf16.msra.mxu0 %v2445_v50  ;;  %v2575_v50 = vld [vmem:[#allocation2 + $0x530] ss:$8 sps:$4 sm:$0xff]  }
  0xae   :  { %1468 = vmatprep.subr.bf16.mxu0 %v2453_v51  ;;  %1379 = vmatpush1.bf16.msra.mxu1 %v2533_v6  ;;  %v2580_v51 = vld [vmem:[#allocation2 + $0x544] ss:$8 sps:$4 sm:$0xff]  }
  0xaf   :  { %1380 = vmatprep.subr.bf16.mxu1 %v2541_v7  ;;  %v2619_v6 = vld [vmem:[#allocation5 + $0x48] sm:$0xff]  }
  0xb0   :  { %v2602_v7 = vld [vmem:[#allocation2 + $0x5c0] ss:$8 sps:$4 sm:$0xff]  }
  0xb1   :  { %1469 = vmatpush1.bf16.msra.mxu0 %v2451_v54  ;;  %v2581_v54 = vld [vmem:[#allocation2 + $0x550] ss:$8 sps:$4 sm:$0xff]  }
  0xb2   :  { %1470 = vmatprep.subr.bf16.mxu0 %v2463_v55  ;;  %1381 = vmatpush1.bf16.msra.mxu1 %v2539_v10  ;;  %v2586_v55 = vld [vmem:[#allocation2 + $0x564] ss:$8 sps:$4 sm:$0xff]   ;;  %v2621_v10 = vld [vmem:[#allocation5 + $0x50] sm:$0xff]  }
  0xb3   :  { %1382 = vmatprep.subr.bf16.mxu1 %v2547_v11  ;;  %v2605_v11 = vld [vmem:[#allocation2 + $0x5d0] ss:$8 sps:$4 sm:$0xff]  }
  0xb5   :  { %1471 = vmatpush1.bf16.msra.mxu0 %v2461_v58  ;;  %v2587_v58 = vld [vmem:[#allocation2 + $0x570] ss:$8 sps:$4 sm:$0xff]  }
  0xb6   :  { %1483 = vmatprep.subr.bf16.mxu0 %v2472_v59  ;;  %1383 = vmatpush1.bf16.msra.mxu1 %v2545_v14  ;;  %v2592_v59 = vld [vmem:[#allocation2 + $0x584] ss:$8 sps:$4 sm:$0xff]   ;;  %v2623_v14 = vld [vmem:[#allocation5 + $0x58] sm:$0xff]  }
  0xb7   :  { %1384 = vmatprep.subr.bf16.mxu1 %v2553_v15  ;;  %v2608_v15 = vld [vmem:[#allocation2 + $0x5e0] ss:$8 sps:$4 sm:$0xff]  }
  0xb8   :  { %1473 = vmatmul.mubr.bf16.vlgmr.msra.gmra.mrb[0].mxu0 %v2467_v62  ;;  %v2593_v62 = vld [vmem:[#allocation2 + $0x590] ss:$8 sps:$4 sm:$0xff]  }
  0xb9   :  { %1484 = vmatpush1.bf16.msra.mxu0 %v2470_v63  ;;  %1515 = vmatprep.mubr.bf16.mxu0 %v2565_v1  ;;  %v2598_v63 = vld [vmem:[#allocation2 + $0x5a4] ss:$8 sps:$4 sm:$0xff]   ;;  %v2601_v1 = vld [vmem:[#allocation2 + $0x5b4] ss:$8 sps:$4 sm:$0xff]  }
  0xba   :  { %1485 = vmatprep.subr.bf16.mxu0 %v2478_v0  ;;  %1385 = vmatpush1.bf16.msra.mxu1 %v2551_v18  ;;  %v2596_v0 = vld [vmem:[#allocation2 + $0x5a0] ss:$8 sps:$4 sm:$0xff]  }
  0xbb   :  { %v2625_v18 = vld [vmem:[#allocation5 + $0x60] sm:$0xff]  }
  0xbd   :  { %1486 = vmatpush1.bf16.msra.mxu0 %v2476_v4  ;;  %1387 = vmatmul.mubr.bf16.vlgmr.msra.gmra.mrb[0].mxu1 %v2557_v20  ;;  %v2617_v4 = vld [vmem:[#allocation5 + $0x40] sm:$0xff]  }
  0xbe   :  { %1487 = vmatprep.subr.bf16.mxu0 %v2484_v5  ;;  %v2618_v5 = vld [vmem:[#allocation5] sm:$0xff]   ;;  %2209 = vmatprep.subr.bf16.mxu1 %v2617_v4 }
  0xbf   :  { %2210 = vmatpush3.bf16.msra.mxu1 %v2618_v5  ;;  %v2626_v20 = vld [vmem:[#allocation5 + $0x20] sm:$0xff]  }
  0xc0   :  { %2211 = vmatprep.subr.bf16.mxu1 %v2619_v6 }
  0xc1   :  { %1488 = vmatpush1.bf16.msra.mxu0 %v2482_v8  ;;  %v2607_v8 = vld [vmem:[#allocation2 + $0x5d4] ss:$8 sps:$4 sm:$0xff]  }
  0xc2   :  { %1489 = vmatprep.subr.bf16.mxu0 %v2490_v9  ;;  %v2620_v9 = vld [vmem:[#allocation5 + $0x8] sm:$0xff]  }
  0xc3   :  { %2212 = vmatpush3.bf16.msra.mxu1 %v2620_v9 }
  0xc4   :  { %2213 = vmatprep.subr.bf16.mxu1 %v2621_v10 }
  0xc5   :  { %1490 = vmatpush1.bf16.msra.mxu0 %v2488_v12  ;;  %v2610_v12 = vld [vmem:[#allocation2 + $0x5e4] ss:$8 sps:$4 sm:$0xff]  }
  0xc6   :  { %1491 = vmatprep.subr.bf16.mxu0 %v2496_v13  ;;  %v2622_v13 = vld [vmem:[#allocation5 + $0x10] sm:$0xff]  }
  0xc7   :  { %2214 = vmatpush3.bf16.msra.mxu1 %v2622_v13  ;;  %v2641_v13 = vld [vmem:[#allocation7] sm:$0xff]  }
  0xc8   :  { %2215 = vmatprep.subr.bf16.mxu1 %v2623_v14 }
  0xc9   :  { %1492 = vmatpush1.bf16.msra.mxu0 %v2494_v16  ;;  %v2613_v16 = vld [vmem:[#allocation2 + $0x5f4] ss:$8 sps:$4 sm:$0xff]  }
  0xca   :  { %1493 = vmatprep.subr.bf16.mxu0 %v2502_v17  ;;  %v2624_v17 = vld [vmem:[#allocation5 + $0x18] sm:$0xff]  }
  0xcb   :  { %2216 = vmatpush3.bf16.msra.mxu1 %v2624_v17  ;;  %v2644_v17 = vld [vmem:[#allocation7 + $0x18] sm:$0xff]  }
  0xcc   :  { %2217 = vmatprep.subr.bf16.mxu1 %v2625_v18  ;;  %v2194_v18 = vld [vmem:[%s2953_s6] ss:$0 sm:$0xff]  ;;  %s2711_s6 = scalar_lea.vmem %s1961_s19, 256 }
  0xcd   :  { %1494 = vmatpush1.bf16.msra.mxu0 %v2500_v19  ;;  %v2611_v19 = vld [vmem:[#allocation2 + $0x5f0] ss:$8 sps:$4 sm:$0xff]   ;;  %p2712_p10 = scmp.ne.s32.totalorder %s1961_s19, %s2711_s6  ;;  %p2717_p12 = scmp.lt.s32.totalorder %s2711_s6, %s2711_s6 }
  0xce   :  { %1495 = vmatprep.subr.bf16.mxu0 %v2508_v21  ;;  %v2614_v21 = vld [vmem:[%s2947_s0 + $0x28] ss:$48 sps:$4 sm:$0xff]  }
  0xcf   :  { %2218 = vmatpush3.bf16.msra.mxu1 %v2626_v20  ;;  %p2718_p13 = por %p2717_p12, %p2716_p11 }
  0xd1   :  { %1496 = vmatpush1.bf16.msra.mxu0 %v2506_v22  ;;  %v2627_v22 = vld [vmem:[#allocation5 + $0x68] sm:$0xff]   ;;  %p2719_p0 = pnand %p2718_p13, %p2712_p10 }
  0xd2   :  { %1497 = vmatprep.subr.bf16.mxu0 %v2514_v23  ;;  %2219 = vmatprep.subr.bf16.mxu1 %v2627_v22  ;;  %v2628_v23 = vld [vmem:[#allocation5 + $0x28] sm:$0xff]  }
  0xd3   :  { %2220 = vmatpush3.bf16.msra.mxu1 %v2628_v23 }
  0xd5   :  { %1498 = vmatpush1.bf16.msra.mxu0 %v2512_v24  ;;  %v2629_v24 = vld [vmem:[#allocation5 + $0x70] sm:$0xff]  }
  0xd6   :  { %1499 = vmatprep.subr.bf16.mxu0 %v2520_v25  ;;  %v2630_v25 = vld [vmem:[#allocation5 + $0x30] sm:$0xff]   ;;  %2221 = vmatprep.subr.bf16.mxu1 %v2629_v24 }
  0xd7   :  { %2222 = vmatpush3.bf16.msra.mxu1 %v2630_v25 }
  0xd9   :  { %1500 = vmatpush1.bf16.msra.mxu0 %v2518_v26  ;;  %v2631_v26 = vld [vmem:[#allocation5 + $0x78] sm:$0xff]  }
  0xda   :  { %1501 = vmatprep.subr.bf16.mxu0 %v2526_v27  ;;  %v2632_v27 = vld [vmem:[#allocation5 + $0x38] sm:$0xff]   ;;  %2223 = vmatprep.subr.bf16.mxu1 %v2631_v26 }
  0xdb   :  { %2224 = vmatpush3.bf16.msra.mxu1 %v2632_v27 }
  0xdd   :  { %1502 = vmatpush1.bf16.msra.mxu0 %v2524_v28  ;;  %v2746_v28 = vmov 0.0  }
  0xde   :  { %1503 = vmatprep.subr.bf16.mxu0 %v2532_v29  ;;  %2245 = vmatprep.subr.bf16.mxu1 %v2746_v28 }
  0xe1   :  { %1504 = vmatpush1.bf16.msra.mxu0 %v2530_v30 }
  0xe2   :  { %1505 = vmatprep.subr.bf16.mxu0 %v2538_v31 }
  0xe5   :  { %1506 = vmatpush1.bf16.msra.mxu0 %v2536_v32 }
  0xe6   :  { %1507 = vmatprep.subr.bf16.mxu0 %v2544_v33  ;;  %v281_v33 = vlaneseq }
  0xe9   :  { %1508 = vmatpush1.bf16.msra.mxu0 %v2542_v34  ;;  %v282_v34 = vshrl.u32 %v281_v33, 7 }
  0xea   :  { %1509 = vmatprep.subr.bf16.mxu0 %v2550_v35 }
  0xeb   :  { %v283_v35 = vsub.s32 0, %v282_v34 }
  0xed   :  { %1510 = vmatpush1.bf16.msra.mxu0 %v2548_v36  ;;  %v279_v36 = vld [vmem:[%s2949_s2] sm:$0x3] }
  0xee   :  { %1511 = vmatprep.subr.bf16.mxu0 %v2556_v37  ;;  %v287_v37 = vsub.s32 1, %v282_v34 }
  0xf1   :  { %1512 = vmatpush1.bf16.msra.mxu0 %v2554_v38  ;;  %v284_v38 = vrot.slane %v279_v36, %v283_v35 }
  0xf2   :  { %1513 = vmatprep.subr.bf16.mxu0 %v2562_v39  ;;  %v288_v39 = vrot.slane %v279_v36, %v287_v37 }
  0xf5   :  { %1514 = vmatpush1.bf16.msra.mxu0 %v2560_v40 }
  0xf6   :  { %1526 = vmatprep.subr.bf16.mxu0 %v2568_v41 }
  0xf8   :  { %1516 = vmatmul.mubr.bf16.vlgmr.msra.gmra.mrb[0].mxu0 %v2563_v42 }
  0xf9   :  { %1527 = vmatpush1.bf16.msra.mxu0 %v2566_v43  ;;  %1558 = vmatprep.mubr.bf16.mxu0 %v2616_v44 }
  0xfa   :  { %1528 = vmatprep.subr.bf16.mxu0 %v2571_v45 }
  0xfd   :  { %1529 = vmatpush1.bf16.msra.mxu0 %v2569_v46 }
  0xfe   :  { %1530 = vmatprep.subr.bf16.mxu0 %v2574_v47 }
 0x101   :  { %1531 = vmatpush1.bf16.msra.mxu0 %v2572_v48 }
 0x102   :  { %1532 = vmatprep.subr.bf16.mxu0 %v2577_v49 }
 0x105   :  { %1533 = vmatpush1.bf16.msra.mxu0 %v2575_v50 }
 0x106   :  { %1534 = vmatprep.subr.bf16.mxu0 %v2580_v51 }
 0x109   :  { %1535 = vmatpush1.bf16.msra.mxu0 %v2578_v52 }
 0x10a   :  { %1536 = vmatprep.subr.bf16.mxu0 %v2583_v53 }
 0x10d   :  { %1537 = vmatpush1.bf16.msra.mxu0 %v2581_v54 }
 0x10e   :  { %1538 = vmatprep.subr.bf16.mxu0 %v2586_v55 }
 0x111   :  { %1539 = vmatpush1.bf16.msra.mxu0 %v2584_v56 }
 0x112   :  { %1540 = vmatprep.subr.bf16.mxu0 %v2589_v57 }
 0x115   :  { %1541 = vmatpush1.bf16.msra.mxu0 %v2587_v58  ;;  %v2633_v58 = vld [vmem:[%s2952_s5] sm:$0xff]  }
 0x116   :  { %1542 = vmatprep.subr.bf16.mxu0 %v2592_v59  ;;  %v2634_v59 = vld [vmem:[%s2952_s5 + $0x8] sm:$0xff]  }
 0x119   :  { %1543 = vmatpush1.bf16.msra.mxu0 %v2590_v60  ;;  %v2635_v60 = vld [vmem:[%s2952_s5 + $0x10] sm:$0xff]  }
 0x11a   :  { %1544 = vmatprep.subr.bf16.mxu0 %v2595_v61  ;;  %v2636_v61 = vld [vmem:[%s2952_s5 + $0x18] sm:$0xff]  }
 0x11d   :  { %1545 = vmatpush1.bf16.msra.mxu0 %v2593_v62  ;;  %v2637_v62 = vld [vmem:[%s2952_s5 + $0x20] sm:$0xff]  }
 0x11e   :  { %1546 = vmatprep.subr.bf16.mxu0 %v2598_v63  ;;  %v2638_v63 = vld [vmem:[%s2952_s5 + $0x28] sm:$0xff]  }
 0x121   :  { %1547 = vmatpush1.bf16.msra.mxu0 %v2596_v0  ;;  %v2639_v0 = vld [vmem:[%s2952_s5 + $0x30] sm:$0xff]  }
 0x122   :  { %1548 = vmatprep.subr.bf16.mxu0 %v2601_v1  ;;  %v2640_v1 = vld [vmem:[%s2952_s5 + $0x38] sm:$0xff]  }
 0x125   :  { %1549 = vmatpush1.bf16.msra.mxu0 %v2599_v2 }
 0x126   :  { %1550 = vmatprep.subr.bf16.mxu0 %v2604_v3  ;;  %v2177_v3 = vld [vmem:[%s2951_s4] ss:$0 sm:$0xff] }
 0x129   :  { %1551 = vmatpush1.bf16.msra.mxu0 %v2602_v7 }
 0x12a   :  { %1552 = vmatprep.subr.bf16.mxu0 %v2607_v8 }
 0x12d   :  { %1553 = vmatpush1.bf16.msra.mxu0 %v2605_v11 }
 0x12e   :  { %1554 = vmatprep.subr.bf16.mxu0 %v2610_v12 }
 0x131   :  { %1555 = vmatpush1.bf16.msra.mxu0 %v2608_v15  ;;  %v2642_v15 = vld [vmem:[#allocation7 + $0x8] sm:$0xff]  }
 0x132   :  { %1556 = vmatprep.subr.bf16.mxu0 %v2613_v16  ;;  %v2643_v16 = vld [vmem:[#allocation7 + $0x10] sm:$0xff]  }
 0x135   :  { %1557 = vmatpush1.bf16.msra.mxu0 %v2611_v19 }
 0x138   :  { %1559 = vmatmul.mubr.bf16.vlgmr.msra.gmra.mrb[0].mxu0 %v2614_v21 }
 0x190   :  { %v1388_v29 = vpop.f32.mrb[0].mxu1 }
 0x191   :  { %v1390_v30 = vpop.f32.mrb[1].mxu1  ;;  %v2277_v40 = vadd.f32 %v1388_v29, %v284_v38 }
 0x192   :  { %v1392_v31 = vpop.f32.mrb[2].mxu1  ;;  %v2279_v41 = vadd.f32 %v1390_v30, %v288_v39 }
 0x193   :  { %v1394_v32 = vpop.f32.mrb[3].mxu1  ;;  %v2281_v43 = vadd.f32 %v1392_v31, %v284_v38 }
 0x194   :  { %v2283_v46 = vadd.f32 %v1394_v32, %v288_v39 }
 0x20b   :  { %v1560_v42 = vpop.f32.mrb[0].mxu0 }
 0x20c   :  { %v2278_v44 = vadd.f32 %v2277_v40, %v1560_v42  ;;  %v1562_v45 = vpop.f32.mrb[1].mxu0 }
 0x20d   :  { %v2280_v47 = vadd.f32 %v2279_v41, %v1562_v45  ;;  %v1564_v48 = vpop.f32.mrb[2].mxu0 }
 0x20e   :  { %v2282_v49 = vadd.f32 %v2281_v43, %v1564_v48  ;;  %v1566_v50 = vpop.f32.mrb[3].mxu0  ;;  %v1569_v52 = vmax.f32 %v2278_v44, 0.0 }
 0x20f   :  { %v2284_v51 = vadd.f32 %v2283_v46, %v1566_v50  ;;  %v1570_v54 = vmax.f32 %v2280_v47, 0.0 }
 0x210   :  { %v1571_v53 = vmax.f32 %v2282_v49, 0.0 }
 0x211   :  { %v1572_v55 = vmax.f32 %v2284_v51, 0.0 }
 0x212   :  { %v1573_v56 = vpack.c.bf16 %v1571_v53, %v1569_v52 }
 0x213   :  { %v1574_v57 = vpack.c.bf16 %v1572_v55, %v1570_v54 }
 0x215   :  { %1742 = vmatprep.mubr.bf16.mxu1 %v1574_v57 }
 0x216   :  { %1743 = vmatmul.mubr.bf16.vlgmr.msra.gmra.mrb[4].mxu1 %v1573_v56 }
 0x217   :  { %2246 = vmatpush3.bf16.msra.mxu1 %v2633_v58  ;;  %2261 = vmatprep.mubr.msk.bf16.mxu1 %vm2747_vm0, %v2746_v28 }
 0x218   :  { %2247 = vmatprep.subr.bf16.mxu1 %v2746_v28 }
 0x21b   :  { %2248 = vmatpush3.bf16.msra.mxu1 %v2634_v59 }
 0x21c   :  { %2249 = vmatprep.subr.bf16.mxu1 %v2746_v28 }
 0x21f   :  { %2250 = vmatpush3.bf16.msra.mxu1 %v2635_v60 }
 0x220   :  { %2251 = vmatprep.subr.bf16.mxu1 %v2746_v28 }
 0x223   :  { %2252 = vmatpush3.bf16.msra.mxu1 %v2636_v61 }
 0x224   :  { %2253 = vmatprep.subr.bf16.mxu1 %v2746_v28 }
 0x227   :  { %2254 = vmatpush3.bf16.msra.mxu1 %v2637_v62 }
 0x228   :  { %2255 = vmatprep.subr.bf16.mxu1 %v2746_v28 }
 0x22b   :  { %2256 = vmatpush3.bf16.msra.mxu1 %v2638_v63 }
 0x22c   :  { %2257 = vmatprep.subr.bf16.mxu1 %v2746_v28 }
 0x22f   :  { %2258 = vmatpush3.bf16.msra.mxu1 %v2639_v0 }
 0x230   :  { %2259 = vmatprep.subr.bf16.mxu1 %v2746_v28 }
 0x233   :  { %2260 = vmatpush3.bf16.msra.mxu1 %v2640_v1 }
 0x234   :  { %2265 = vmatprep.subr.bf16.mxu1 %v2746_v28 }
 0x2e9   :  { %v2225_v2 = vpop.f32.mrb[4].mxu1 }
 0x2ea   :  { %v2226_v4 = vpop.f32.mrb[5].mxu1 }
 0x2eb   :  { %v2227_v5 = vadd.f32 %v2226_v4, %v2225_v2  ;;  %v2228_v6 = vpop.f32.mrb[6].mxu1 }
 0x2ec   :  { %v2229_v7 = vpop.f32.mrb[7].mxu1 }
 0x2ed   :  { %v1745_v8 = vadd.f32 %v2227_v5, %v2177_v3  ;;  %v2230_v9 = vadd.f32 %v2229_v7, %v2228_v6 }
 0x2ef   :  { %v1748_v10 = vadd.f32 %v2230_v9, %v2177_v3  ;;  %v1751_v11 = vmax.f32 %v1745_v8, 0.0 }
 0x2f1   :  { %v1752_v12 = vmax.f32 %v1748_v10, 0.0 }
 0x2f3   :  { %v1753_v14 = vpack.c.bf16 %v1752_v12, %v1751_v11 }
 0x2f5   :  { %2262 = vmatmul.mubr.bf16.vlgmr.msra.gmra.mrb[8].mxu1 %v1753_v14 }
 0x2f6   :  { %2266 = vmatpush3.bf16.msra.mxu1 %v2641_v13  ;;  %2273 = vmatprep.mubr.msk.bf16.mxu1 %vm2747_vm0, %v2746_v28 }
 0x2f7   :  { %2267 = vmatprep.subr.bf16.mxu1 %v2746_v28 }
 0x2fa   :  { %2268 = vmatpush3.bf16.msra.mxu1 %v2642_v15 }
 0x2fb   :  { %2269 = vmatprep.subr.bf16.mxu1 %v2746_v28 }
 0x2fe   :  { %2270 = vmatpush3.bf16.msra.mxu1 %v2643_v16 }
 0x2ff   :  { %2271 = vmatprep.subr.bf16.mxu1 %v2746_v28  ;;  %v2203_v28 = vld [vmem:[%s2955_s8] ss:$0 sm:$0xff] }
 0x302   :  { %2272 = vmatpush3.bf16.msra.mxu1 %v2644_v17 }
 0x3c8   :  { %v1859_v19 = vpop.f32.mrb[8].mxu1 }
 0x3c9   :  { %v1860_v20 = vadd.f32 %v2194_v18, %v1859_v19  ;;  %v2263_v21 = vpop.f32.mrb[9].mxu1 }
 0x3ca   :  { %v1862_v22 = vpop.f32.mrb[10].mxu1 }
 0x3cb   :  { %v1863_v23 = vadd.f32 %v2194_v18, %v1862_v22  ;;  %v2264_v24 = vpop.f32.mrb[11].mxu1  ;;  %v1866_v25 = vmax.f32 %v1860_v20, 0.0 }
 0x3cd   :  { %v1867_v26 = vmax.f32 %v1863_v23, 0.0 }
 0x3cf   :  { %v1868_v27 = vpack.c.bf16 %v1867_v26, %v1866_v25 }
 0x3d1   :  { %2274 = vmatmul.mubr.msk.bf16.vlgmr.msra.gmra.mrb[12].mxu1 %vm1908_vm1, %v1868_v27 }
 0x4a4   :  { %v1946_v29 = vpop.f32.mrb[12].mxu1 }
 0x4a5   :  { %v1947_v30 = vadd.f32 %v2203_v28, %v1946_v29  ;;  %v2275_v31 = vpop.f32.mrb[13].mxu1 }
 0x4a6   :  { %v1949_v32 = vpop.f32.mrb[14].mxu1 }
 0x4a7   :  { %1953 = vst [vmem:[#allocation8] sm:$0xff] %v1947_v30  ;;  %v1950_v33 = vadd.f32 %v2203_v28, %v1949_v32  ;;  %v2276_v34 = vpop.f32.mrb[15].mxu1 }
 0x4a9   :  { %1954 = vst [vmem:[#allocation8 + $0x8] sm:$0xff] %v1950_v33 }
 0x4aa   :  { %2722 = shalt.err (!%p2719_p0)
}
 0x4ab   :  { %s2723_s20 = scalar_lea.hbm %s2956_s9, 256 }
 0x4ac   :  { %p2724_p1 = scmp.ne.s32.totalorder %s2956_s9, %s2723_s20  ;;  %p2727_p2 = scmp.lt.u32.totalorder %s2723_s20, %s2956_s9 }
 0x4ae   :  { %p2729_p3 = pnand %p2727_p2, %p2724_p1 }
 0x4b0   :  { %2732 = shalt.err (!%p2729_p3)
}
 0x4b1   :  { %1966 = dma.vmem_to_hbm [thread:$0]  %s1961_s19, 256, %s2956_s9, [#allocation4], %s2743_s3, %s2743_s3, %s2744_s10  }
 0x4b2   :  { %2737 = dma.done.wait [#allocation4], 256  }
 0x4b3   :  { %2738 = vsyncadd [#allocation4], 4294967040 }
 0x4b4   :  { %1970 = vsyncpa [#allocation3], 1 }
 0x4b5   :  { %1971 = vsyncpa [#allocation6], 1 }
 0x4b6   :  { %1972 = vsyncpa [#allocation4], 1 }

</bundles_post_ra>
